<compile_context>
chip_gen: v5e
topology: v5e:2x2
jax: 0.10.0
libtpu: 0.0.40
codegen_flags: <defaults>
</compile_context>

<pallas_src>
import jax
import jax.numpy as jnp
from jax.experimental import pallas as pl
from jax.experimental.pallas import tpu as pltpu


def autoencoder_kernel(x_ref, wg_ref, bg_ref, wh_ref, bh_ref, o_ref):
    """Fused forward for one row tile: sigmoid(sigmoid(x@Wg + bg)@Wh + bh).

    Weights arrive pre-transposed to canonical (contract, out) layout, so both
    matmuls are plain MXU dots (no per-step XLU transpose).  The cast of the
    f32 x tile to the compute dtype (bf16 path) happens here, per tile.
    """
    x = x_ref[...].astype(wg_ref.dtype)                       # (TB, nq)
    pre_g = jnp.dot(x, wg_ref[...],
                    preferred_element_type=jnp.float32)       # (TB, k)  f32 acc
    encoded = jax.nn.sigmoid(pre_g + bg_ref[...])             # EUP logistic
    pre_h = jnp.dot(encoded.astype(wh_ref.dtype), wh_ref[...],
                    preferred_element_type=jnp.float32)       # (TB, nq) f32 acc
    o_ref[...] = jax.nn.sigmoid(pre_h + bh_ref[...]).astype(o_ref.dtype)


def _round_up(x, m):
    return ((x + m - 1) // m) * m


def _select_tile_b(B, nq, x_itemsize, out_itemsize, align):
    """Row-tile size: VMEM-budget-capped, single step for small B."""
    # Budget for the double-buffered x / out row tiles only (safe under v5e's
    # 16 MiB default scoped VMEM, leaves room for resident weights + scratch).
    budget = 12 * 1024 * 1024
    bytes_per_row = nq * (x_itemsize + out_itemsize)
    cap = max(align, (budget // (2 * max(bytes_per_row, 1))) // align * align)
    cap = min(cap, 2048)                      # large tiles -> ~roofline DMAs
    if B > 256:
        # Enough work to amortize per-step overhead; also guarantees >= 2 grid
        # steps so the "parallel" axis can shard across v7x's two TensorCores.
        tile_b = min(cap, _round_up(pl.cdiv(B, 2), align))
    else:
        # Small batch: one grid step (v5e/v6e have a single TensorCore, so a
        # forced second step is pure ~0.35 us/step overhead with no overlap).
        tile_b = min(cap, _round_up(B, align))
    return max(align, tile_b)


def autoencoder_forward(x, g_weight, g_bias, h_weight, h_bias, *,
                        tile_b=None, use_bf16=False, out_dtype=None):
    """Fused AutoEncoder forward.

    x:        (B, num_question) float32
    g_weight: (k, num_question), g_bias: (k,)    -- PyTorch nn.Linear layout
    h_weight: (num_question, k), h_bias: (num_question,)
    use_bf16: feed the MXU bf16 operands (f32 accumulation); looser tolerance.
    out_dtype: output dtype (default: x.dtype); bf16 halves output HBM traffic.
    """
    B, nq = x.shape
    k = g_weight.shape[0]
    assert g_weight.shape == (k, nq) and g_bias.shape == (k,)
    assert h_weight.shape == (nq, k) and h_bias.shape == (nq,)

    compute_dtype = jnp.bfloat16 if use_bf16 else x.dtype
    out_dtype = x.dtype if out_dtype is None else out_dtype
    x_itemsize = jnp.dtype(x.dtype).itemsize
    w_itemsize = jnp.dtype(compute_dtype).itemsize
    o_itemsize = jnp.dtype(out_dtype).itemsize

    # ---- row-tile selection -------------------------------------------------
    align = 16 if use_bf16 else 8
    if tile_b is None:
        tile_b = _select_tile_b(B, nq, x_itemsize, o_itemsize, align)
    else:
        tile_b = max(align, _round_up(int(tile_b), align))
    grid = (pl.cdiv(B, tile_b),)   # ragged last block handled by Pallas masking

    # ---- operands (one-time, KiB-scale transposes/casts; no pass over x) ----
    wg = g_weight.T.astype(compute_dtype)            # (nq, k): canonical layout
    wh = h_weight.T.astype(compute_dtype)            # (k, nq): canonical layout
    bg = g_bias.reshape(1, k).astype(jnp.float32)
    bh = h_bias.reshape(1, nq).astype(jnp.float32)

    # ---- advisory cost + VMEM limit ------------------------------------------
    cost = pl.CostEstimate(
        flops=4 * B * nq * k,                         # two (B,nq)x(nq,k) matmuls
        transcendentals=B * (nq + k),                 # one exp per sigmoid elem
        bytes_accessed=int(B * nq * (x_itemsize + o_itemsize)
                           + 2 * nq * k * w_itemsize  # weights, read once
                           + (nq + k) * 4),           # biases
    )
    # Double-buffered x/out tiles + double-buffered resident weights + biases.
    footprint = (2 * tile_b * nq * (x_itemsize + o_itemsize)
                 + 2 * 2 * nq * k * w_itemsize
                 + 2 * (nq + k) * 4)
    vmem_limit = None
    if footprint * 3 // 2 > (14 << 20):               # may exceed v5e's 16 MiB
        vmem_limit = int(min(max(footprint * 3 // 2, 32 << 20), 48 << 20))

    out = pl.pallas_call(
        autoencoder_kernel,
        out_shape=jax.ShapeDtypeStruct((B, nq), out_dtype),
        grid_spec=pltpu.PrefetchScalarGridSpec(
            num_scalar_prefetch=0,
            grid=grid,
            in_specs=[
                pl.BlockSpec((tile_b, nq), lambda i: (i, 0)),   # x row tile
                # Constant index_maps: DMA'd once, VMEM-resident across grid.
                pl.BlockSpec((nq, k),      lambda i: (0, 0)),   # Wg^T (nq, k)
                pl.BlockSpec((1, k),       lambda i: (0, 0)),   # bg
                pl.BlockSpec((k, nq),      lambda i: (0, 0)),   # Wh^T (k, nq)
                pl.BlockSpec((1, nq),      lambda i: (0, 0)),   # bh
            ],
            out_specs=pl.BlockSpec((tile_b, nq), lambda i: (i, 0)),
        ),
        compiler_params=pltpu.CompilerParams(
            dimension_semantics=("parallel",),
            vmem_limit_bytes=vmem_limit),
        cost_estimate=cost,
    )(x, wg, bg, wh, bh)
    return out


if __name__ == "__main__":
    # Small shapes consistent with the module: num_question features per user
    # vector, hidden size k (module default k=100).  B=30 exercises the ragged
    # last block (tile_b auto-selects 32, grid=(1,), masked boundary store).
    B = 30
    NUM_QUESTION = 256
    K = 100

    key = jax.random.PRNGKey(0)
    kx, kgw, kgb, khw, khb = jax.random.split(key, 5)

    # Deterministic params mimicking PyTorch nn.Linear default init bounds.
    bound_g = 1.0 / (NUM_QUESTION ** 0.5)
    bound_h = 1.0 / (K ** 0.5)
    g_weight = jax.random.uniform(kgw, (K, NUM_QUESTION), jnp.float32,
                                  -bound_g, bound_g)
    g_bias = jax.random.uniform(kgb, (K,), jnp.float32, -bound_g, bound_g)
    h_weight = jax.random.uniform(khw, (NUM_QUESTION, K), jnp.float32,
                                  -bound_h, bound_h)
    h_bias = jax.random.uniform(khb, (NUM_QUESTION,), jnp.float32,
                                -bound_h, bound_h)

    x = jax.random.uniform(kx, (B, NUM_QUESTION), jnp.float32)

    # Pure-JAX reference (same semantics as the PyTorch forward).
    ref = jax.nn.sigmoid(
        jax.nn.sigmoid(x @ g_weight.T + g_bias) @ h_weight.T + h_bias)

    # Exact f32 path.
    out = autoencoder_forward(x, g_weight, g_bias, h_weight, h_bias)
    out = jax.block_until_ready(out)
    assert out.shape == (B, NUM_QUESTION)
    assert jnp.allclose(out, ref, atol=1e-5, rtol=1e-5)

    # bf16-operand path (f32 accumulation, in-kernel per-tile cast of x).
    out_bf16 = jax.block_until_ready(
        autoencoder_forward(x, g_weight, g_bias, h_weight, h_bias,
                            use_bf16=True))
    assert jnp.allclose(out_bf16, ref, atol=2e-2, rtol=2e-2)

    print("KERNEL_OK")
</pallas_src>

<mosaic_0001>
module attributes {stable_mosaic.version = 11 : i64} {
  func.func @autoencoder_kernel(%arg0: i32, %arg1: memref<32x256xf32, #tpu.memory_space<vmem>>, %arg2: memref<256x100xf32, #tpu.memory_space<vmem>>, %arg3: memref<1x100xf32, #tpu.memory_space<vmem>>, %arg4: memref<100x256xf32, #tpu.memory_space<vmem>>, %arg5: memref<1x256xf32, #tpu.memory_space<vmem>>, %arg6: memref<32x256xf32, #tpu.memory_space<vmem>>) attributes {dimension_semantics = [#tpu.dimension_semantics<parallel>], iteration_bounds = array<i64: 1>, scalar_prefetch = 0 : i64, scratch_operands = 0 : i64, tpu.core_type = #tpu.core_type<tc>, window_params = [{transform_indices = @transform_0, window_bounds = array<i64: 32, 256>}, {pipeline_mode = #tpu.pipeline_mode<synchronous>, transform_indices = @transform_1, window_bounds = array<i64: 256, 100>}, {pipeline_mode = #tpu.pipeline_mode<synchronous>, transform_indices = @transform_2, window_bounds = array<i64: 1, 100>}, {pipeline_mode = #tpu.pipeline_mode<synchronous>, transform_indices = @transform_3, window_bounds = array<i64: 100, 256>}, {pipeline_mode = #tpu.pipeline_mode<synchronous>, transform_indices = @transform_4, window_bounds = array<i64: 1, 256>}, {transform_indices = @transform_5, window_bounds = array<i64: 32, 256>}]} {
    %c0 = arith.constant 0 : index
    %c0_0 = arith.constant 0 : index
    %0 = vector.load %arg1[%c0, %c0_0] : memref<32x256xf32, #tpu.memory_space<vmem>>, vector<32x256xf32>
    %c0_1 = arith.constant 0 : index
    %c0_2 = arith.constant 0 : index
    %1 = vector.load %arg2[%c0_1, %c0_2] : memref<256x100xf32, #tpu.memory_space<vmem>>, vector<256x100xf32>
    %cst = arith.constant dense<0.000000e+00> : vector<32x100xf32>
    %2 = tpu.matmul %0, %1, %cst {dimension_numbers = #tpu.dot_dimension_numbers<[1], [0], [0], [1], [0, 0, 1, 1], [], []>} : vector<32x256xf32>, vector<256x100xf32>, vector<32x100xf32> -> vector<32x100xf32>
    %c0_3 = arith.constant 0 : index
    %c0_4 = arith.constant 0 : index
    %3 = vector.load %arg3[%c0_3, %c0_4] : memref<1x100xf32, #tpu.memory_space<vmem>>, vector<1x100xf32>
    %4 = vector.broadcast %3 : vector<1x100xf32> to vector<32x100xf32>
    %5 = arith.addf %2, %4 : vector<32x100xf32>
    %6 = arith.negf %5 : vector<32x100xf32>
    %7 = math.exp %6 : vector<32x100xf32>
    %cst_5 = arith.constant 1.000000e+00 : f32
    %8 = vector.broadcast %cst_5 : f32 to vector<32x100xf32>
    %9 = arith.addf %8, %7 : vector<32x100xf32>
    %10 = arith.divf %8, %9 : vector<32x100xf32>
    %c0_6 = arith.constant 0 : index
    %c0_7 = arith.constant 0 : index
    %11 = vector.load %arg4[%c0_6, %c0_7] : memref<100x256xf32, #tpu.memory_space<vmem>>, vector<100x256xf32>
    %cst_8 = arith.constant dense<0.000000e+00> : vector<32x256xf32>
    %12 = tpu.matmul %10, %11, %cst_8 {dimension_numbers = #tpu.dot_dimension_numbers<[1], [0], [0], [1], [0, 0, 1, 1], [], []>} : vector<32x100xf32>, vector<100x256xf32>, vector<32x256xf32> -> vector<32x256xf32>
    %c0_9 = arith.constant 0 : index
    %c0_10 = arith.constant 0 : index
    %13 = vector.load %arg5[%c0_9, %c0_10] : memref<1x256xf32, #tpu.memory_space<vmem>>, vector<1x256xf32>
    %14 = vector.broadcast %13 : vector<1x256xf32> to vector<32x256xf32>
    %15 = arith.addf %12, %14 : vector<32x256xf32>
    %16 = arith.negf %15 : vector<32x256xf32>
    %17 = math.exp %16 : vector<32x256xf32>
    %cst_11 = arith.constant 1.000000e+00 : f32
    %18 = vector.broadcast %cst_11 : f32 to vector<32x256xf32>
    %19 = arith.addf %18, %17 : vector<32x256xf32>
    %20 = arith.divf %18, %19 : vector<32x256xf32>
    %c0_12 = arith.constant 0 : index
    %c0_13 = arith.constant 0 : index
    %21 = vector.load %arg6[%c0_12, %c0_13] : memref<32x256xf32, #tpu.memory_space<vmem>>, vector<32x256xf32>
    tpu.vector_store %arg6[%c0_12, %c0_13], %20 {strides = array<i32>} : memref<32x256xf32, #tpu.memory_space<vmem>>, vector<32x256xf32>,
    return
  }
  func.func @transform_0(%arg0: i32) -> (i32, i32) {
    %c0_i32 = arith.constant 0 : i32
    %c0_i32_0 = arith.constant 0 : i32
    return %arg0, %c0_i32 : i32, i32
  }
  func.func @transform_1(%arg0: i32) -> (i32, i32) {
    %c0_i32 = arith.constant 0 : i32
    %c0_i32_0 = arith.constant 0 : i32
    %c0_i32_1 = arith.constant 0 : i32
    return %c0_i32, %c0_i32_0 : i32, i32
  }
  func.func @transform_2(%arg0: i32) -> (i32, i32) {
    %c0_i32 = arith.constant 0 : i32
    %c0_i32_0 = arith.constant 0 : i32
    %c0_i32_1 = arith.constant 0 : i32
    return %c0_i32, %c0_i32_0 : i32, i32
  }
  func.func @transform_3(%arg0: i32) -> (i32, i32) {
    %c0_i32 = arith.constant 0 : i32
    %c0_i32_0 = arith.constant 0 : i32
    %c0_i32_1 = arith.constant 0 : i32
    return %c0_i32, %c0_i32_0 : i32, i32
  }
  func.func @transform_4(%arg0: i32) -> (i32, i32) {
    %c0_i32 = arith.constant 0 : i32
    %c0_i32_0 = arith.constant 0 : i32
    %c0_i32_1 = arith.constant 0 : i32
    return %c0_i32, %c0_i32_0 : i32, i32
  }
  func.func @transform_5(%arg0: i32) -> (i32, i32) {
    %c0_i32 = arith.constant 0 : i32
    %c0_i32_0 = arith.constant 0 : i32
    return %arg0, %c0_i32 : i32, i32
  }
}

</mosaic_0001>

<bundles_post_ra>
// kernel: tpu_custom_call.1
= control target key start
LH: loop header
LB: loop body
LE: loop exit
PB: predicated region body
PF: predicated region fallthrough
CT: control target
= control target key end

     0   :  { %s870_s0 = inlined_call_operand.vmem [shape: f32[30,256], index: 0, kind: input, shape index: {}]   ;;  %s871_s1 = inlined_call_operand.vmem [shape: f32[256,100], index: 1, kind: input, shape index: {}]   ;;  %s872_s2 = inlined_call_operand.vmem [shape: f32[1,100], index: 2, kind: input, shape index: {}]   ;;  %s873_s3 = inlined_call_operand.vmem [shape: f32[100,256], index: 3, kind: input, shape index: {}]   ;;  %s874_s4 = inlined_call_operand.vmem [shape: f32[1,256], index: 4, kind: input, shape index: {}]   ;;  %s875_s5 = inlined_call_operand.hbm [shape: f32[30,256], index: 5, kind: output, shape index: {}]  }
   0x1   :  { %v44_v0 = vld [vmem:[%s871_s1 + $0x78] sm:$0xff]  ;;  %v43_v1 = vld [vmem:[%s871_s1 + $0x70] sm:$0xff]  ;;  %v42_v4 = vld [vmem:[%s871_s1 + $0x68] sm:$0xff] }
   0x2   :  { %v60_v2 = vld [vmem:[%s871_s1 + $0xf8] sm:$0xff]  ;;  %65 = vmatpush.msra.mxu0 %v44_v0  ;;  %v59_v3 = vld [vmem:[%s871_s1 + $0xf0] sm:$0xff]  ;;  %v58_v5 = vld [vmem:[%s871_s1 + $0xe8] sm:$0xff] }
   0x3   :  { %94 = vmatpush.msra.mxu1 %v60_v2  ;;  %v41_v6 = vld [vmem:[%s871_s1 + $0x60] sm:$0xff]  ;;  %v40_v8 = vld [vmem:[%s871_s1 + $0x58] sm:$0xff]  ;;  %v39_v10 = vld [vmem:[%s871_s1 + $0x50] sm:$0xff] }
   0x4   :  { %66 = vmatpush.msra.mxu0 %v43_v1  ;;  %v57_v7 = vld [vmem:[%s871_s1 + $0xe0] sm:$0xff]  ;;  %v56_v9 = vld [vmem:[%s871_s1 + $0xd8] sm:$0xff]  ;;  %v55_v11 = vld [vmem:[%s871_s1 + $0xd0] sm:$0xff] }
   0x5   :  { %95 = vmatpush.msra.mxu1 %v59_v3  ;;  %v38_v12 = vld [vmem:[%s871_s1 + $0x48] sm:$0xff]  ;;  %v37_v14 = vld [vmem:[%s871_s1 + $0x40] sm:$0xff] }
   0x6   :  { %67 = vmatpush.msra.mxu0 %v42_v4  ;;  %v54_v13 = vld [vmem:[%s871_s1 + $0xc8] sm:$0xff]  ;;  %v53_v15 = vld [vmem:[%s871_s1 + $0xc0] sm:$0xff] }
   0x7   :  { %96 = vmatpush.msra.mxu1 %v58_v5 }
   0x8   :  { %68 = vmatpush.msra.mxu0 %v41_v6 }
   0x9   :  { %97 = vmatpush.msra.mxu1 %v57_v7 }
   0xa   :  { %69 = vmatpush.msra.mxu0 %v40_v8 }
   0xb   :  { %98 = vmatpush.msra.mxu1 %v56_v9 }
   0xc   :  { %70 = vmatpush.msra.mxu0 %v39_v10 }
   0xd   :  { %99 = vmatpush.msra.mxu1 %v55_v11 }
   0xe   :  { %10 = vsyncpa [#allocation3], 0  ;;  %71 = vmatpush.msra.mxu0 %v38_v12  ;;  %v36_v16 = vld [vmem:[%s871_s1 + $0x38] sm:$0xff]  ;;  %v35_v18 = vld [vmem:[%s871_s1 + $0x30] sm:$0xff]  ;;  %vm244_vm0 = vcmask 1043456   ;;  %vm231_vm4 = vcmask 818176  }
   0xf   :  { %100 = vmatpush.msra.mxu1 %v54_v13  ;;  %v52_v17 = vld [vmem:[%s871_s1 + $0xb8] sm:$0xff]  ;;  %v51_v19 = vld [vmem:[%s871_s1 + $0xb0] sm:$0xff]  ;;  %v34_v20 = vld [vmem:[%s871_s1 + $0x28] sm:$0xff]  ;;  %s475_s25 = sshll.u32 %s875_s5, 4  ;;  %s588_s26 = smov 256   ;;  %s476_s25 = int_to_ptr.hbm [resolvable:$true] %s475_s25 }
  0x10   :  { %72 = vmatpush.msra.mxu0 %v37_v14  ;;  %v50_v21 = vld [vmem:[%s871_s1 + $0xa8] sm:$0xff]  ;;  %v33_v22 = vld [vmem:[%s871_s1 + $0x20] sm:$0xff]  ;;  %v32_v24 = vld [vmem:[%s871_s1 + $0x18] sm:$0xff]  ;;  %s589_s27 = smov 16  }
  0x11   :  { %101 = vmatpush.msra.mxu1 %v53_v15  ;;  %v49_v23 = vld [vmem:[%s871_s1 + $0xa0] sm:$0xff]  ;;  %v48_v25 = vld [vmem:[%s871_s1 + $0x98] sm:$0xff]  ;;  %v31_v26 = vld [vmem:[%s871_s1 + $0x10] sm:$0xff] }
  0x12   :  { %73 = vmatpush.msra.mxu0 %v36_v16  ;;  %v47_v27 = vld [vmem:[%s871_s1 + $0x90] sm:$0xff]  ;;  %v30_v28 = vld [vmem:[%s871_s1 + $0x8] sm:$0xff]  ;;  %v29_v30 = vld [vmem:[%s871_s1] sm:$0xff] }
  0x13   :  { %102 = vmatpush.msra.mxu1 %v52_v17  ;;  %v46_v29 = vld [vmem:[%s871_s1 + $0x88] sm:$0xff]  ;;  %v45_v31 = vld [vmem:[%s871_s1 + $0x80] sm:$0xff]  ;;  %v23_v34 = vld [vmem:[%s870_s0 + $0x10] sm:$0xff] }
  0x14   :  { %74 = vmatpush.msra.mxu0 %v35_v18  ;;  %v21_v32 = vld [vmem:[%s870_s0] sm:$0xff]  ;;  %v22_v33 = vld [vmem:[%s870_s0 + $0x8] sm:$0xff]  ;;  %v24_v35 = vld [vmem:[%s870_s0 + $0x18] sm:$0xff] }
  0x15   :  { %103 = vmatpush.msra.mxu1 %v51_v19  ;;  %v25_v36 = vld [vmem:[%s870_s0 + $0x20] sm:$0xff]  ;;  %v26_v37 = vld [vmem:[%s870_s0 + $0x28] sm:$0xff]  ;;  %v27_v38 = vld [vmem:[%s870_s0 + $0x30] sm:$0xff] }
  0x16   :  { %75 = vmatpush.msra.mxu0 %v34_v20  ;;  %v28_v39 = vld [vmem:[%s870_s0 + $0x38] sm:$0xff]  ;;  %v223_v40 = vld [vmem:[%s873_s3 + $0xc0] sm:$0xf]  ;;  %v224_v41 = vld [vmem:[%s873_s3 + $0xc8] sm:$0xf] }
  0x17   :  { %104 = vmatpush.msra.mxu1 %v50_v21  ;;  %491 = vmatpush.msk.msra.mxu2 %vm244_vm0, %v223_v40  ;;  %v221_v42 = vld [vmem:[%s873_s3 + $0xb0] sm:$0xff]  ;;  %v222_v43 = vld [vmem:[%s873_s3 + $0xb8] sm:$0xff]  ;;  %v219_v44 = vld [vmem:[%s873_s3 + $0xa0] sm:$0xff] }
  0x18   :  { %76 = vmatpush.msra.mxu0 %v33_v22  ;;  %496 = vmatpush.msk.msra.mxu3 %vm244_vm0, %v224_v41  ;;  %v220_v45 = vld [vmem:[%s873_s3 + $0xa8] sm:$0xff]  ;;  %v217_v46 = vld [vmem:[%s873_s3 + $0x90] sm:$0xff]  ;;  %v218_v47 = vld [vmem:[%s873_s3 + $0x98] sm:$0xff] }
  0x19   :  { %105 = vmatpush.msra.mxu1 %v49_v23  ;;  %255 = vmatpush.msra.mxu2 %v221_v42  ;;  %v215_v48 = vld [vmem:[%s873_s3 + $0x80] sm:$0xff]  ;;  %v216_v49 = vld [vmem:[%s873_s3 + $0x88] sm:$0xff]  ;;  %v213_v50 = vld [vmem:[%s873_s3 + $0x70] sm:$0xff] }
  0x1a   :  { %77 = vmatpush.msra.mxu0 %v32_v24  ;;  %284 = vmatpush.msra.mxu3 %v222_v43  ;;  %v214_v51 = vld [vmem:[%s873_s3 + $0x78] sm:$0xff]  ;;  %v211_v52 = vld [vmem:[%s873_s3 + $0x60] sm:$0xff]  ;;  %v212_v53 = vld [vmem:[%s873_s3 + $0x68] sm:$0xff] }
  0x1b   :  { %106 = vmatpush.msra.mxu1 %v48_v25  ;;  %256 = vmatpush.msra.mxu2 %v219_v44  ;;  %v209_v54 = vld [vmem:[%s873_s3 + $0x50] sm:$0xff]  ;;  %v210_v55 = vld [vmem:[%s873_s3 + $0x58] sm:$0xff]  ;;  %v207_v56 = vld [vmem:[%s873_s3 + $0x40] sm:$0xff] }
  0x1c   :  { %78 = vmatpush.msra.mxu0 %v31_v26  ;;  %285 = vmatpush.msra.mxu3 %v220_v45  ;;  %v208_v57 = vld [vmem:[%s873_s3 + $0x48] sm:$0xff]  ;;  %v205_v58 = vld [vmem:[%s873_s3 + $0x30] sm:$0xff]  ;;  %v206_v59 = vld [vmem:[%s873_s3 + $0x38] sm:$0xff] }
  0x1d   :  { %107 = vmatpush.msra.mxu1 %v47_v27  ;;  %257 = vmatpush.msra.mxu2 %v217_v46  ;;  %v203_v60 = vld [vmem:[%s873_s3 + $0x20] sm:$0xff]  ;;  %v204_v61 = vld [vmem:[%s873_s3 + $0x28] sm:$0xff]  ;;  %v201_v63 = vld [vmem:[%s873_s3 + $0x10] sm:$0xff] }
  0x1e   :  { %79 = vmatpush.msra.mxu0 %v30_v28  ;;  %286 = vmatpush.msra.mxu3 %v218_v47  ;;  %v512_v62 = vld [vmem:[%s872_s2] ss:$0 sm:$0xff]  ;;  %v202_v0 = vld [vmem:[%s873_s3 + $0x18] sm:$0xff]  ;;  %v200_v2 = vld [vmem:[%s873_s3 + $0x8] sm:$0xff] }
  0x1f   :  { %108 = vmatpush.msra.mxu1 %v46_v29  ;;  %258 = vmatpush.msra.mxu2 %v215_v48  ;;  %v199_v1 = vld [vmem:[%s873_s3] sm:$0xff] }
  0x20   :  { %80 = vmatpush.msra.mxu0 %v29_v30  ;;  %287 = vmatpush.msra.mxu3 %v216_v49 }
  0x21   :  { %109 = vmatpush.msra.mxu1 %v45_v31  ;;  %81 = vmatmul.f32.vlgmr.msra.gmra.mxu0 %v21_v32 }
  0x22   :  { %110 = vmatmul.f32.vlgmr.msra.gmra.mxu1 %v22_v33  ;;  %259 = vmatpush.msra.mxu2 %v213_v50 }
  0x23   :  { %288 = vmatpush.msra.mxu3 %v214_v51 }
  0x24   :  { %260 = vmatpush.msra.mxu2 %v211_v52 }
  0x25   :  { %289 = vmatpush.msra.mxu3 %v212_v53 }
  0x26   :  { %261 = vmatpush.msra.mxu2 %v209_v54 }
  0x27   :  { %290 = vmatpush.msra.mxu3 %v210_v55 }
  0x28   :  { %262 = vmatpush.msra.mxu2 %v207_v56 }
  0x29   :  { %84 = vmatmul.f32.gmra.mxu0 %v23_v34  ;;  %291 = vmatpush.msra.mxu3 %v208_v57 }
  0x2a   :  { %113 = vmatmul.f32.gmra.mxu1 %v24_v35  ;;  %263 = vmatpush.msra.mxu2 %v205_v58 }
  0x2b   :  { %292 = vmatpush.msra.mxu3 %v206_v59 }
  0x2c   :  { %264 = vmatpush.msra.mxu2 %v203_v60 }
  0x2d   :  { %293 = vmatpush.msra.mxu3 %v204_v61 }
  0x2e   :  { %265 = vmatpush.msra.mxu2 %v201_v63 }
  0x2f   :  { %294 = vmatpush.msra.mxu3 %v202_v0 }
  0x30   :  { %266 = vmatpush.msra.mxu2 %v199_v1 }
  0x31   :  { %87 = vmatmul.f32.gmra.mxu0 %v25_v36  ;;  %295 = vmatpush.msra.mxu3 %v200_v2 }
  0x32   :  { %116 = vmatmul.f32.gmra.mxu1 %v26_v37 }
  0x39   :  { %90 = vmatmul.f32.gmra.mxu0 %v27_v38 }
  0x3a   :  { %119 = vmatmul.f32.gmra.mxu1 %v28_v39 }
  0x9e   :  { %v82_v3 = vpop.f32.mrf.mxu0 }
  0x9f   :  { %v111_v4 = vpop.f32.mrf.mxu1  ;;  %v83_v5 = vadd.f32 %v512_v62, %v82_v3 }
  0xa1   :  { %v112_v6 = vadd.f32 %v111_v4, %v83_v5 }
  0xa3   :  { %v487_v7 = vmul.f32 -1.442695, %v112_v6 }
  0xa5   :  { %513 = vpow2.f32 %v487_v7  ;;  %v225_v7 = vld [vmem:[%s874_s4] sm:$0x3]  ;;  %s587_s4 = smov [#allocation2]  }
  0xa6   :  { %v85_v8 = vpop.f32.mrf.mxu0  ;;  %s473_s22 = sshll.u32 %s587_s4, 4  ;;  %s474_s22 = int_to_ptr.vmem [resolvable:$true] %s473_s22 }
  0xa7   :  { %v114_v9 = vpop.f32.mrf.mxu1  ;;  %v86_v10 = vadd.f32 %v512_v62, %v85_v8  ;;  %v227_v8 = vperm.slane %v225_v7, 0 }
  0xa9   :  { %v115_v11 = vadd.f32 %v114_v9, %v86_v10  ;;  %v832_v9 = vperm.slane %v225_v7, 1 }
  0xab   :  { %v514_v12 = vpop.eup %513  ;;  %v488_v13 = vmul.f32 -1.442695, %v115_v11 }
  0xac   :  { %v135_v14 = vadd.f32 1.0, %v514_v12 }
  0xad   :  { %515 = vpow2.f32 %v488_v13 }
  0xae   :  { %517 = vrcp.f32 %v135_v14  ;;  %v88_v15 = vpop.f32.mrf.mxu0  ;;  %v150_v28 = vand.u32 2147483648, %v135_v14  ;;  %v148_v31 = vand.u32 2147483647, %v135_v14  ;;  %vm144_vm2 = vweird.f32 %v135_v14 }
  0xaf   :  { %v117_v16 = vpop.f32.mrf.mxu1  ;;  %v89_v17 = vadd.f32 %v512_v62, %v88_v15 }
  0xb0   :  { %v151_v37 = vor.u32 1.1754944e-38, %v150_v28  ;;  %vm149_vm5 = vcmp.eq.f32.partialorder %v148_v31, 8.507059e+37 }
  0xb1   :  { %v118_v18 = vadd.f32 %v117_v16, %v89_v17 }
  0xb3   :  { %v516_v19 = vpop.eup %515  ;;  %v489_v20 = vmul.f32 -1.442695, %v118_v18 }
  0xb4   :  { %v518_v21 = vpop.eup %517  ;;  %v136_v22 = vadd.f32 1.0, %v516_v19 }
  0xb5   :  { %519 = vpow2.f32 %v489_v20  ;;  %v140_v23 = vmul.f32 %v518_v21, %v135_v14  ;;  %vm145_vm1 = vweird.f32 %v518_v21 }
  0xb6   :  { %521 = vrcp.f32 %v136_v22  ;;  %v91_v24 = vpop.f32.mrf.mxu0  ;;  %vm146_vm3 = vmor %vm144_vm2, %vm145_vm1  ;;  %v165_v42 = vand.u32 2147483648, %v136_v22  ;;  %v163_v44 = vand.u32 2147483647, %v136_v22  ;;  %vm159_vm7 = vweird.f32 %v136_v22 }
  0xb7   :  { %v120_v25 = vpop.f32.mrf.mxu1  ;;  %v92_v26 = vadd.f32 %v512_v62, %v91_v24  ;;  %v141_v27 = vsub.f32 1.0, %v140_v23 }
  0xb8   :  { %v166_v49 = vor.u32 1.1754944e-38, %v165_v42  ;;  %vm164_vm9 = vcmp.eq.f32.partialorder %v163_v44, 8.507059e+37 }
  0xb9   :  { %v121_v29 = vadd.f32 %v120_v25, %v92_v26  ;;  %v142_v30 = vmul.f32 %v518_v21, %v141_v27 }
  0xbb   :  { %v520_v32 = vpop.eup %519  ;;  %v490_v33 = vmul.f32 -1.442695, %v121_v29  ;;  %v143_v34 = vadd.f32 %v518_v21, %v142_v30 }
  0xbc   :  { %v522_v35 = vpop.eup %521  ;;  %v137_v36 = vadd.f32 1.0, %v520_v32 }
  0xbd   :  { %523 = vpow2.f32 %v490_v33  ;;  %v147_v38 = vsel %vm146_vm3, %v518_v21, %v143_v34  ;;  %v155_v39 = vmul.f32 %v522_v35, %v136_v22  ;;  %vm160_vm6 = vweird.f32 %v522_v35 }
  0xbe   :  { %525 = vrcp.f32 %v137_v36  ;;  %v152_v40 = vsel %vm149_vm5, %v151_v37, %v147_v38  ;;  %vm161_vm8 = vmor %vm159_vm7, %vm160_vm6  ;;  %v180_v54 = vand.u32 2147483648, %v137_v36  ;;  %v178_v56 = vand.u32 2147483647, %v137_v36 }
  0xbf   :  { %492 = vmatmul.msk.f32.vlgmr.msra.gmra.mxu2 %vm231_vm4, %v152_v40  ;;  %497 = vmatmul.msk.f32.vlgmr.msra.gmra.mxu3 %vm231_vm4, %v152_v40  ;;  %v156_v41 = vsub.f32 1.0, %v155_v39  ;;  %vm174_vm11 = vweird.f32 %v137_v36 }
  0xc0   :  { %v181_v59 = vor.u32 1.1754944e-38, %v180_v54  ;;  %vm179_vm13 = vcmp.eq.f32.partialorder %v178_v56, 8.507059e+37 }
  0xc1   :  { %v157_v43 = vmul.f32 %v522_v35, %v156_v41 }
  0xc3   :  { %v524_v45 = vpop.eup %523  ;;  %v158_v46 = vadd.f32 %v522_v35, %v157_v43 }
  0xc4   :  { %v526_v47 = vpop.eup %525  ;;  %v138_v48 = vadd.f32 1.0, %v524_v45 }
  0xc5   :  { %v162_v50 = vsel %vm161_vm8, %v522_v35, %v158_v46  ;;  %v170_v51 = vmul.f32 %v526_v47, %v137_v36  ;;  %vm175_vm10 = vweird.f32 %v526_v47 }
  0xc6   :  { %527 = vrcp.f32 %v138_v48  ;;  %v167_v52 = vsel %vm164_vm9, %v166_v49, %v162_v50  ;;  %vm176_vm12 = vmor %vm174_vm11, %vm175_vm10  ;;  %v195_v0 = vand.u32 2147483648, %v138_v48  ;;  %v193_v2 = vand.u32 2147483647, %v138_v48 }
  0xc7   :  { %493 = vmatmul.msk.f32.gmra.mxu2 %vm231_vm4, %v167_v52  ;;  %498 = vmatmul.msk.f32.gmra.mxu3 %vm231_vm4, %v167_v52  ;;  %v171_v53 = vsub.f32 1.0, %v170_v51  ;;  %vm189_vm15 = vweird.f32 %v138_v48 }
  0xc8   :  { %v196_v4 = vor.u32 1.1754944e-38, %v195_v0  ;;  %vm194_vm1 = vcmp.eq.f32.partialorder %v193_v2, 8.507059e+37 }
  0xc9   :  { %v172_v55 = vmul.f32 %v526_v47, %v171_v53 }
  0xcb   :  { %v173_v57 = vadd.f32 %v526_v47, %v172_v55 }
  0xcc   :  { %v528_v58 = vpop.eup %527 }
  0xcd   :  { %v177_v60 = vsel %vm176_vm12, %v526_v47, %v173_v57  ;;  %v185_v61 = vmul.f32 %v528_v58, %v138_v48  ;;  %vm190_vm14 = vweird.f32 %v528_v58 }
  0xce   :  { %v182_v62 = vsel %vm179_vm13, %v181_v59, %v177_v60  ;;  %vm191_vm0 = vmor %vm189_vm15, %vm190_vm14 }
  0xcf   :  { %494 = vmatmul.msk.f32.gmra.mxu2 %vm231_vm4, %v182_v62  ;;  %499 = vmatmul.msk.f32.gmra.mxu3 %vm231_vm4, %v182_v62  ;;  %v186_v63 = vsub.f32 1.0, %v185_v61 }
  0xd1   :  { %v187_v1 = vmul.f32 %v528_v58, %v186_v63 }
  0xd3   :  { %v188_v3 = vadd.f32 %v528_v58, %v187_v1 }
  0xd5   :  { %v192_v5 = vsel %vm191_vm0, %v528_v58, %v188_v3 }
  0xd6   :  { %v197_v6 = vsel %vm194_vm1, %v196_v4, %v192_v5 }
  0xd7   :  { %495 = vmatmul.msk.f32.gmra.mxu2 %vm231_vm4, %v197_v6  ;;  %500 = vmatmul.msk.f32.gmra.mxu3 %vm231_vm4, %v197_v6 }
 0x142   :  { %v268_v10 = vpop.f32.mrf.mxu2  ;;  %v297_v11 = vpop.f32.mrf.mxu3 }
 0x143   :  { %v269_v12 = vadd.f32 %v268_v10, %v227_v8  ;;  %v298_v13 = vadd.f32 %v297_v11, %v832_v9 }
 0x145   :  { %v501_v14 = vmul.f32 -1.442695, %v269_v12  ;;  %v502_v15 = vmul.f32 -1.442695, %v298_v13 }
 0x147   :  { %529 = vpow2.f32 %v501_v14 }
 0x148   :  { %531 = vpow2.f32 %v502_v15 }
 0x14a   :  { %v271_v16 = vpop.f32.mrf.mxu2  ;;  %v300_v17 = vpop.f32.mrf.mxu3 }
 0x14b   :  { %v272_v18 = vadd.f32 %v271_v16, %v227_v8  ;;  %v301_v19 = vadd.f32 %v300_v17, %v832_v9 }
 0x14d   :  { %v530_v20 = vpop.eup %529  ;;  %v503_v21 = vmul.f32 -1.442695, %v272_v18  ;;  %v504_v24 = vmul.f32 -1.442695, %v301_v19 }
 0x14e   :  { %v532_v22 = vpop.eup %531  ;;  %v333_v23 = vadd.f32 1.0, %v530_v20 }
 0x14f   :  { %v334_v25 = vadd.f32 1.0, %v532_v22  ;;  %533 = vpow2.f32 %v503_v21 }
 0x150   :  { %535 = vrcp.f32 %v333_v23  ;;  %v350_v40 = vand.u32 2147483647, %v333_v23  ;;  %v352_v42 = vand.u32 2147483648, %v333_v23  ;;  %vm346_vm3 = vweird.f32 %v333_v23 }
 0x151   :  { %537 = vrcp.f32 %v334_v25  ;;  %v367_v44 = vand.u32 2147483648, %v334_v25  ;;  %v365_v48 = vand.u32 2147483647, %v334_v25  ;;  %vm361_vm6 = vweird.f32 %v334_v25 }
 0x152   :  { %539 = vpow2.f32 %v504_v24  ;;  %v274_v26 = vpop.f32.mrf.mxu2  ;;  %v303_v27 = vpop.f32.mrf.mxu3  ;;  %vm351_vm5 = vcmp.eq.f32.partialorder %v350_v40, 8.507059e+37  ;;  %v353_v54 = vor.u32 1.1754944e-38, %v352_v42 }
 0x153   :  { %v275_v28 = vadd.f32 %v274_v26, %v227_v8  ;;  %v304_v29 = vadd.f32 %v303_v27, %v832_v9  ;;  %v368_v56 = vor.u32 1.1754944e-38, %v367_v44  ;;  %vm366_vm9 = vcmp.eq.f32.partialorder %v365_v48, 8.507059e+37 }
 0x155   :  { %v534_v30 = vpop.eup %533  ;;  %v505_v31 = vmul.f32 -1.442695, %v275_v28  ;;  %v506_v34 = vmul.f32 -1.442695, %v304_v29 }
 0x156   :  { %v536_v32 = vpop.eup %535  ;;  %v837_v33 = vadd.f32 1.0, %v534_v30 }
 0x157   :  { %v538_v35 = vpop.eup %537  ;;  %v342_v36 = vmul.f32 %v536_v32, %v333_v23  ;;  %541 = vpow2.f32 %v505_v31  ;;  %vm347_vm2 = vweird.f32 %v536_v32 }
 0x158   :  { %v540_v37 = vpop.eup %539  ;;  %v357_v38 = vmul.f32 %v538_v35, %v334_v25  ;;  %543 = vrcp.f32 %v837_v33  ;;  %vm362_vm4 = vweird.f32 %v538_v35  ;;  %vm348_vm7 = vmor %vm346_vm3, %vm347_vm2  ;;  %v382_v4 = vand.u32 2147483648, %v837_v33 }
 0x159   :  { %v343_v39 = vsub.f32 1.0, %v342_v36  ;;  %v840_v41 = vadd.f32 1.0, %v540_v37  ;;  %545 = vpow2.f32 %v506_v34  ;;  %vm363_vm8 = vmor %vm361_vm6, %vm362_vm4  ;;  %vm376_vm11 = vweird.f32 %v837_v33 }
 0x15a   :  { %v358_v43 = vsub.f32 1.0, %v357_v38  ;;  %v277_v45 = vpop.f32.mrf.mxu2  ;;  %v306_v49 = vpop.f32.mrf.mxu3  ;;  %v383_v14 = vor.u32 1.1754944e-38, %v382_v4 }
 0x15b   :  { %v344_v46 = vmul.f32 %v536_v32, %v343_v39  ;;  %547 = vrcp.f32 %v840_v41  ;;  %v278_v52 = vadd.f32 %v277_v45, %v227_v8  ;;  %v307_v61 = vadd.f32 %v306_v49, %v832_v9 }
 0x15c   :  { %v359_v47 = vmul.f32 %v538_v35, %v358_v43  ;;  %v380_v8 = vand.u32 2147483647, %v837_v33  ;;  %v397_v12 = vand.u32 2147483648, %v840_v41  ;;  %v395_v16 = vand.u32 2147483647, %v840_v41 }
 0x15d   :  { %v542_v50 = vpop.eup %541  ;;  %v345_v51 = vadd.f32 %v536_v32, %v344_v46  ;;  %v507_v60 = vmul.f32 -1.442695, %v278_v52  ;;  %v508_v9 = vmul.f32 -1.442695, %v307_v61  ;;  %vm391_vm15 = vweird.f32 %v840_v41 }
 0x15e   :  { %v544_v53 = vpop.eup %543  ;;  %v360_v55 = vadd.f32 %v538_v35, %v359_v47  ;;  %v843_v57 = vadd.f32 1.0, %v542_v50  ;;  %vm381_vm14 = vcmp.eq.f32.partialorder %v380_v8, 8.507059e+37  ;;  %v398_v22 = vor.u32 1.1754944e-38, %v397_v12 }
 0x15f   :  { %v349_v58 = vsel %vm348_vm7, %v536_v32, %v345_v51  ;;  %v372_v59 = vmul.f32 %v544_v53, %v837_v33  ;;  %v546_v62 = vpop.eup %545  ;;  %vm377_vm10 = vweird.f32 %v544_v53  ;;  %vm396_vm1 = vcmp.eq.f32.partialorder %v395_v16, 8.507059e+37 }
 0x160   :  { %v354_v63 = vsel %vm351_vm5, %v353_v54, %v349_v58  ;;  %v364_v0 = vsel %vm363_vm8, %v538_v35, %v360_v55  ;;  %549 = vrcp.f32 %v843_v57  ;;  %v851_v6 = vadd.f32 1.0, %v546_v62  ;;  %vm378_vm12 = vmor %vm376_vm11, %vm377_vm10 }
 0x161   :  { %v548_v1 = vpop.eup %547  ;;  %461 = vst [vmem:[#allocation2] sm:$0xff] %v354_v63  ;;  %v369_v2 = vsel %vm366_vm9, %v368_v56, %v364_v0  ;;  %v373_v3 = vsub.f32 1.0, %v372_v59  ;;  %551 = vpow2.f32 %v507_v60  ;;  %v410_v27 = vand.u32 2147483647, %v843_v57 }
 0x162   :  { %462 = vst [vmem:[#allocation2 + $0x8] sm:$0xff] %v369_v2  ;;  %v387_v5 = vmul.f32 %v548_v1, %v840_v41  ;;  %553 = vrcp.f32 %v851_v6  ;;  %vm392_vm13 = vweird.f32 %v548_v1  ;;  %v412_v28 = vand.u32 2147483648, %v843_v57 }
 0x163   :  { %v374_v7 = vmul.f32 %v544_v53, %v373_v3  ;;  %555 = vpow2.f32 %v508_v9  ;;  %vm393_vm0 = vmor %vm391_vm15, %vm392_vm13  ;;  %vm406_vm3 = vweird.f32 %v843_v57  ;;  %vm411_vm5 = vcmp.eq.f32.partialorder %v410_v27, 8.507059e+37 }
 0x164   :  { %v388_v10 = vsub.f32 1.0, %v387_v5  ;;  %v413_v36 = vor.u32 1.1754944e-38, %v412_v28  ;;  %v425_v37 = vand.u32 2147483647, %v851_v6  ;;  %v427_v38 = vand.u32 2147483648, %v851_v6 }
 0x165   :  { %v375_v11 = vadd.f32 %v544_v53, %v374_v7  ;;  %vm421_vm7 = vweird.f32 %v851_v6 }
 0x166   :  { %v550_v13 = vpop.eup %549  ;;  %v389_v15 = vmul.f32 %v548_v1, %v388_v10  ;;  %v428_v44 = vor.u32 1.1754944e-38, %v427_v38  ;;  %vm426_vm9 = vcmp.eq.f32.partialorder %v425_v37, 8.507059e+37 }
 0x167   :  { %v379_v17 = vsel %vm378_vm12, %v544_v53, %v375_v11  ;;  %v402_v18 = vmul.f32 %v550_v13, %v843_v57  ;;  %v552_v19 = vpop.eup %551  ;;  %vm407_vm2 = vweird.f32 %v550_v13 }
 0x168   :  { %v384_v20 = vsel %vm381_vm14, %v383_v14, %v379_v17  ;;  %v390_v21 = vadd.f32 %v548_v1, %v389_v15  ;;  %v339_v24 = vadd.f32 1.0, %v552_v19  ;;  %v554_v25 = vpop.eup %553  ;;  %vm408_vm4 = vmor %vm406_vm3, %vm407_vm2 }
 0x169   :  { %463 = vst [vmem:[#allocation2 + $0x10] sm:$0xff] %v384_v20  ;;  %v403_v23 = vsub.f32 1.0, %v402_v18  ;;  %v556_v29 = vpop.eup %555  ;;  %v417_v32 = vmul.f32 %v554_v25, %v851_v6  ;;  %vm422_vm6 = vweird.f32 %v554_v25 }
 0x16a   :  { %v394_v26 = vsel %vm393_vm0, %v548_v1, %v390_v21  ;;  %557 = vrcp.f32 %v339_v24  ;;  %v340_v35 = vadd.f32 1.0, %v556_v29  ;;  %vm423_vm8 = vmor %vm421_vm7, %vm422_vm6  ;;  %v442_v50 = vand.u32 2147483648, %v339_v24 }
 0x16b   :  { %v399_v30 = vsel %vm396_vm1, %v398_v22, %v394_v26  ;;  %v404_v31 = vmul.f32 %v550_v13, %v403_v23  ;;  %v418_v34 = vsub.f32 1.0, %v417_v32  ;;  %v440_v53 = vand.u32 2147483647, %v339_v24 }
 0x16c   :  { %464 = vst [vmem:[#allocation2 + $0x18] sm:$0xff] %v399_v30  ;;  %559 = vrcp.f32 %v340_v35  ;;  %vm436_vm11 = vweird.f32 %v339_v24  ;;  %v457_v56 = vand.u32 2147483648, %v340_v35  ;;  %v443_v57 = vor.u32 1.1754944e-38, %v442_v50 }
 0x16d   :  { %v405_v33 = vadd.f32 %v550_v13, %v404_v31  ;;  %v419_v40 = vmul.f32 %v554_v25, %v418_v34  ;;  %v455_v59 = vand.u32 2147483647, %v340_v35  ;;  %vm441_vm14 = vcmp.eq.f32.partialorder %v440_v53, 8.507059e+37 }
 0x16e   :  { %vm451_vm15 = vweird.f32 %v340_v35  ;;  %v458_v63 = vor.u32 1.1754944e-38, %v457_v56 }
 0x16f   :  { %v409_v39 = vsel %vm408_vm4, %v550_v13, %v405_v33  ;;  %v420_v42 = vadd.f32 %v554_v25, %v419_v40  ;;  %vm456_vm1 = vcmp.eq.f32.partialorder %v455_v59, 8.507059e+37 }
 0x170   :  { %v414_v41 = vsel %vm411_vm5, %v413_v36, %v409_v39  ;;  %v558_v43 = vpop.eup %557 }
 0x171   :  { %465 = vst [vmem:[#allocation2 + $0x20] sm:$0xff] %v414_v41  ;;  %v424_v45 = vsel %vm423_vm8, %v554_v25, %v420_v42  ;;  %v432_v46 = vmul.f32 %v558_v43, %v339_v24  ;;  %vm437_vm10 = vweird.f32 %v558_v43 }
 0x172   :  { %v429_v47 = vsel %vm426_vm9, %v428_v44, %v424_v45  ;;  %v560_v48 = vpop.eup %559  ;;  %vm438_vm12 = vmor %vm436_vm11, %vm437_vm10 }
 0x173   :  { %466 = vst [vmem:[#allocation2 + $0x28] sm:$0xff] %v429_v47  ;;  %v433_v49 = vsub.f32 1.0, %v432_v46  ;;  %v447_v51 = vmul.f32 %v560_v48, %v340_v35  ;;  %vm452_vm13 = vweird.f32 %v560_v48 }
 0x174   :  { %vm453_vm0 = vmor %vm451_vm15, %vm452_vm13 }
 0x175   :  { %v434_v52 = vmul.f32 %v558_v43, %v433_v49  ;;  %v448_v54 = vsub.f32 1.0, %v447_v51 }
 0x177   :  { %v435_v55 = vadd.f32 %v558_v43, %v434_v52  ;;  %v449_v58 = vmul.f32 %v560_v48, %v448_v54 }
 0x179   :  { %v439_v60 = vsel %vm438_vm12, %v558_v43, %v435_v55  ;;  %v450_v62 = vadd.f32 %v560_v48, %v449_v58 }
 0x17a   :  { %v444_v61 = vsel %vm441_vm14, %v443_v57, %v439_v60 }
 0x17b   :  { %467 = vst [vmem:[#allocation2 + $0x30] sm:$0xff] %v444_v61  ;;  %v454_v0 = vsel %vm453_vm0, %v560_v48, %v450_v62 }
 0x17c   :  { %v459_v1 = vsel %vm456_vm1, %v458_v63, %v454_v0 }
 0x17d   :  { %468 = vst [vmem:[#allocation2 + $0x38] sm:$0xff] %v459_v1 }
 0x17e   :  { %481 = dma.vmem_to_hbm [thread:$0]  %s474_s22, 1024, %s476_s25, [#allocation3], %s588_s26, %s588_s26, %s589_s27  }
 0x17f   :  { %585 = dma.done.wait [#allocation3], 1024  }
 0x180   :  { %586 = vsyncadd [#allocation3], 4294966272 }
 0x181   :  { %486 = vsyncpa [#allocation3], 1 }

</bundles_post_ra>
